<compile_context>
chip_gen: v6e
topology: v6e:2x2x1
jax: 0.10.0
libtpu: 0.0.40
codegen_flags: <defaults>
</compile_context>

<pallas_src>
import jax
import jax.numpy as jnp
from jax import lax
from jax.experimental import pallas as pl
from jax.experimental.pallas import tpu as pltpu


def _round_up(v, m):
    return (v + m - 1) // m * m


# ----------------------------- Pallas kernel -----------------------------
def _categorical_kernel(x_ref, wt_ref, b_ref, logp_ref):
    # x_ref:    [TB, K]  batch tile (pipelined / double-buffered)
    # wt_ref:   [K, N]   pre-transposed weight (VMEM-resident across the grid)
    # b_ref:    [1, N]   bias (VMEM-resident)
    # logp_ref: [TB, N]  normalized log-probs: z - logsumexp(z)
    # Native-dtype operands into the MXU (bf16 ok on all gens), f32 accumulate.
    z = jnp.dot(x_ref[...], wt_ref[...], preferred_element_type=jnp.float32)
    z = z + b_ref[...].astype(jnp.float32)

    # torch.distributions.Categorical(logits=z) normalization (f32 throughout).
    m = jnp.max(z, axis=-1, keepdims=True)
    e = jnp.exp(z - m)
    s = jnp.sum(e, axis=-1, keepdims=True)
    lse = m + jnp.log(s)

    logp_ref[...] = (z - lse).astype(logp_ref.dtype)


# ------------------------------ tile sizing -------------------------------
def _pick_block_rows(B, K, N, x_itemsize, out_itemsize, requested):
    # Lane-padded per-row VMEM bytes: the last dim of each block is stored as
    # a multiple of 128 lanes, and each pipelined operand is double-buffered.
    row_bytes = 2 * (_round_up(K, 128) * x_itemsize +
                     _round_up(N, 128) * out_itemsize)
    vmem_budget = 20 * 1024 * 1024  # conservative; fits every gen (v7x: 64 MiB/TC)

    if requested is not None:
        tb = int(requested)
    else:
        tb = min(8192, max(8, vmem_budget // row_bytes))
        # Ensure >= 2 grid steps so the "parallel" axis can use both v7x cores.
        if B > 8 and tb >= B:
            tb = (B + 1) // 2

    tb = min(tb, B)
    if tb < B:
        # (8,128) rule: a block dim that is not the full array dim must be a
        # multiple of 8 on the sublane axis.
        tb = max(8, (tb // 8) * 8)
    return tb


# ------------------------------- wrapper ----------------------------------
def categorical_forward(x, weight, bias, *, block_rows=None, out_dtype=jnp.float32):
    """x: [B, K]; weight: [N, K] (PyTorch layout); bias: [N].

    Returns normalized log-probs logp: [B, N] in `out_dtype` (default f32).
    """
    B, K = x.shape
    N = weight.shape[0]

    # One-time, tiny: PyTorch [N, K] -> [K, N] and match x's dtype so the MXU
    # sees homogeneous operands (bf16 path: halves HBM read bytes).
    wt = weight.T.astype(x.dtype)
    b2 = bias.reshape(1, N).astype(jnp.float32)

    x_itemsize = jnp.dtype(x.dtype).itemsize
    out_itemsize = jnp.dtype(out_dtype).itemsize
    tb = _pick_block_rows(B, K, N, x_itemsize, out_itemsize, block_rows)
    grid = (pl.cdiv(B, tb),)  # partial last block handled by Pallas; no jnp.pad

    # VMEM limit: lane-padded, double-buffered x/out tiles + resident w/b + slack.
    tile_bytes = 2 * tb * (_round_up(K, 128) * x_itemsize +
                           _round_up(N, 128) * out_itemsize)
    resident_bytes = _round_up(K, 8) * _round_up(N, 128) * x_itemsize + 128 * 4
    vmem_limit = min(max(32 << 20, int(1.5 * tile_bytes) + resident_bytes + (2 << 20)),
                     112 << 20)

    cost = pl.CostEstimate(
        flops=2 * B * K * N,
        transcendentals=B * N,  # exp per logit (+ log per row, negligible)
        bytes_accessed=B * (K * x_itemsize + N * out_itemsize)
        + K * N * x_itemsize + N * 4,
    )

    logp = pl.pallas_call(
        _categorical_kernel,
        out_shape=jax.ShapeDtypeStruct((B, N), out_dtype),
        grid=grid,
        in_specs=[
            pl.BlockSpec((tb, K), lambda i: (i, 0)),   # x tile (pipelined)
            pl.BlockSpec((K, N), lambda i: (0, 0)),    # weight (VMEM-resident)
            pl.BlockSpec((1, N), lambda i: (0, 0)),    # bias (VMEM-resident)
        ],
        out_specs=pl.BlockSpec((tb, N), lambda i: (i, 0)),
        compiler_params=pltpu.CompilerParams(
            dimension_semantics=("parallel",),  # megacore sharding on v7x
            vmem_limit_bytes=vmem_limit,
        ),
        cost_estimate=cost,
    )(x, wt, b2)

    return logp


# ------------------------ FixedCategorical analogue ----------------------
class FixedCategoricalJax:
    """Mimics FixedCategorical's mode()/log_probs()/sample() from the kernel's
    normalized logits (same internal convention as torch Categorical)."""

    def __init__(self, normalized_logits):
        self.logits = normalized_logits  # == z - logsumexp(z)

    @property
    def probs(self):
        return jnp.exp(self.logits)      # derived lazily; no extra kernel write

    def mode(self):
        return jnp.argmax(self.logits, axis=-1, keepdims=True)

    def log_probs(self, actions):
        a = actions.reshape(actions.shape[0], -1)
        lp = jnp.take_along_axis(self.logits, a, axis=-1)
        return lp.reshape(actions.shape[0], -1).sum(-1, keepdims=True)

    def sample(self, key):
        # TODO(synk): RNG draw kept outside the Pallas kernel (plain JAX).
        return jax.random.categorical(key, self.logits, axis=-1)[..., None]


# ----------------------------- parameter init ----------------------------
def orthogonal_init(key, shape, gain):
    """Deterministic orthogonal init (same spirit as nn.init.orthogonal_)."""
    rows, cols = shape
    big, small = max(rows, cols), min(rows, cols)
    a = jax.random.normal(key, (big, small), dtype=jnp.float32)
    q, r = jnp.linalg.qr(a)
    q = q * jnp.sign(jnp.diag(r))[None, :]
    if rows < cols:
        q = q.T
    return gain * q[:rows, :cols]


# --------------------------------- main ----------------------------------
if __name__ == "__main__":
    num_inputs, num_outputs = 32, 16

    key = jax.random.PRNGKey(0)
    kx, kw, ks, kx2 = jax.random.split(key, 4)

    weight = orthogonal_init(kw, (num_outputs, num_inputs), gain=0.01)
    bias = jnp.zeros((num_outputs,), dtype=jnp.float32)

    def ref_logp(xa):
        z = xa.astype(jnp.float32) @ weight.T + bias
        return z - jax.scipy.special.logsumexp(z, axis=-1, keepdims=True)

    # --- case 1: B=64, auto tile (>=2 grid steps -> exercises megacore path)
    B1 = 64
    x1 = jax.random.normal(kx, (B1, num_inputs), dtype=jnp.float32)
    logp1 = categorical_forward(x1, weight, bias)
    jax.block_until_ready(logp1)
    assert logp1.shape == (B1, num_outputs)
    assert jnp.allclose(logp1, ref_logp(x1), atol=1e-5)

    # --- case 2: B=50 with tb=16 -> partial last block, no wrapper-side pad
    B2 = 50
    x2 = jax.random.normal(kx2, (B2, num_inputs), dtype=jnp.float32)
    logp2 = categorical_forward(x2, weight, bias, block_rows=16)
    jax.block_until_ready(logp2)
    assert logp2.shape == (B2, num_outputs)
    assert jnp.allclose(logp2, ref_logp(x2), atol=1e-5)

    # --- case 3: bf16 activations fed straight to the MXU (no in-kernel upcast)
    logp3 = categorical_forward(x1.astype(jnp.bfloat16), weight, bias, block_rows=32)
    jax.block_until_ready(logp3)
    assert jnp.allclose(logp3, ref_logp(x1), atol=2e-2)

    # --- distribution API on top of the kernel output
    dist = FixedCategoricalJax(logp1)
    probs = dist.probs
    mode = dist.mode()
    lp = dist.log_probs(mode)
    samp = dist.sample(ks)
    jax.block_until_ready((probs, mode, lp, samp))
    assert jnp.allclose(probs.sum(-1), 1.0, atol=1e-5)
    assert mode.shape == (B1, 1) and lp.shape == (B1, 1) and samp.shape == (B1, 1)

    print("KERNEL_OK")
</pallas_src>

<mosaic_0001>
module attributes {stable_mosaic.version = 11 : i64} {
  func.func @_categorical_kernel(%arg0: i32, %arg1: memref<32x32xf32, #tpu.memory_space<vmem>>, %arg2: memref<32x16xf32, #tpu.memory_space<vmem>>, %arg3: memref<1x16xf32, #tpu.memory_space<vmem>>, %arg4: memref<32x16xf32, #tpu.memory_space<vmem>>) attributes {dimension_semantics = [#tpu.dimension_semantics<parallel>], iteration_bounds = array<i64: 2>, scalar_prefetch = 0 : i64, scratch_operands = 0 : i64, tpu.core_type = #tpu.core_type<tc>, window_params = [{transform_indices = @transform_0, window_bounds = array<i64: 32, 32>}, {pipeline_mode = #tpu.pipeline_mode<synchronous>, transform_indices = @transform_1, window_bounds = array<i64: 32, 16>}, {pipeline_mode = #tpu.pipeline_mode<synchronous>, transform_indices = @transform_2, window_bounds = array<i64: 1, 16>}, {transform_indices = @transform_3, window_bounds = array<i64: 32, 16>}]} {
    %c0 = arith.constant 0 : index
    %c0_0 = arith.constant 0 : index
    %0 = vector.load %arg1[%c0, %c0_0] : memref<32x32xf32, #tpu.memory_space<vmem>>, vector<32x32xf32>
    %c0_1 = arith.constant 0 : index
    %c0_2 = arith.constant 0 : index
    %1 = vector.load %arg2[%c0_1, %c0_2] : memref<32x16xf32, #tpu.memory_space<vmem>>, vector<32x16xf32>
    %cst = arith.constant dense<0.000000e+00> : vector<32x16xf32>
    %2 = tpu.matmul %0, %1, %cst {dimension_numbers = #tpu.dot_dimension_numbers<[1], [0], [0], [1], [0, 0, 1, 1], [], []>} : vector<32x32xf32>, vector<32x16xf32>, vector<32x16xf32> -> vector<32x16xf32>
    %c0_3 = arith.constant 0 : index
    %c0_4 = arith.constant 0 : index
    %3 = vector.load %arg3[%c0_3, %c0_4] : memref<1x16xf32, #tpu.memory_space<vmem>>, vector<1x16xf32>
    %4 = vector.broadcast %3 : vector<1x16xf32> to vector<32x16xf32>
    %5 = arith.addf %2, %4 : vector<32x16xf32>
    %cst_5 = arith.constant dense<0xFF800000> : vector<32xf32>
    %6 = vector.multi_reduction <maximumf>, %5, %cst_5 [1] : vector<32x16xf32> to vector<32xf32>
    %7 = vector.shape_cast %6 : vector<32xf32> to vector<32x1xf32>
    %8 = vector.broadcast %7 : vector<32x1xf32> to vector<32x16xf32>
    %9 = arith.subf %5, %8 : vector<32x16xf32>
    %10 = math.exp %9 : vector<32x16xf32>
    %cst_6 = arith.constant dense<0.000000e+00> : vector<32xf32>
    %11 = vector.multi_reduction <add>, %10, %cst_6 [1] : vector<32x16xf32> to vector<32xf32>
    %12 = vector.shape_cast %11 : vector<32xf32> to vector<32x1xf32>
    %13 = math.log %12 : vector<32x1xf32>
    %14 = arith.addf %7, %13 : vector<32x1xf32>
    %15 = vector.broadcast %14 : vector<32x1xf32> to vector<32x16xf32>
    %16 = arith.subf %5, %15 : vector<32x16xf32>
    %c0_7 = arith.constant 0 : index
    %c0_8 = arith.constant 0 : index
    %17 = vector.load %arg4[%c0_7, %c0_8] : memref<32x16xf32, #tpu.memory_space<vmem>>, vector<32x16xf32>
    tpu.vector_store %arg4[%c0_7, %c0_8], %16 {strides = array<i32>} : memref<32x16xf32, #tpu.memory_space<vmem>>, vector<32x16xf32>,
    return
  }
  func.func @transform_0(%arg0: i32) -> (i32, i32) {
    %c0_i32 = arith.constant 0 : i32
    %c0_i32_0 = arith.constant 0 : i32
    return %arg0, %c0_i32 : i32, i32
  }
  func.func @transform_1(%arg0: i32) -> (i32, i32) {
    %c0_i32 = arith.constant 0 : i32
    %c0_i32_0 = arith.constant 0 : i32
    %c0_i32_1 = arith.constant 0 : i32
    return %c0_i32, %c0_i32_0 : i32, i32
  }
  func.func @transform_2(%arg0: i32) -> (i32, i32) {
    %c0_i32 = arith.constant 0 : i32
    %c0_i32_0 = arith.constant 0 : i32
    %c0_i32_1 = arith.constant 0 : i32
    return %c0_i32, %c0_i32_0 : i32, i32
  }
  func.func @transform_3(%arg0: i32) -> (i32, i32) {
    %c0_i32 = arith.constant 0 : i32
    %c0_i32_0 = arith.constant 0 : i32
    return %arg0, %c0_i32 : i32, i32
  }
}

</mosaic_0001>

<bundles_post_ra>
// kernel: tpu_custom_call.1
= control target key start
LH: loop header
LB: loop body
LE: loop exit
PB: predicated region body
PF: predicated region fallthrough
CT: control target
= control target key end

     0   :  { %s498_s12 = smov 0   ;;  %s564_s0 = inlined_call_operand.vmem [shape: f32[64,32], index: 0, kind: input, shape index: {}]   ;;  %s565_s1 = inlined_call_operand.vmem [shape: f32[32,16], index: 1, kind: input, shape index: {}]   ;;  %s566_s2 = inlined_call_operand.vmem [shape: f32[1,16], index: 2, kind: input, shape index: {}]   ;;  %s567_s3 = inlined_call_operand.vmem [shape: f32[64,16], index: 3, kind: output, shape index: {}]  }
   0x1 LB: > { %s400_s13 = sadd.s32 4294967295, %s476_s12   ;;  %p404_p0 = scmp.ge.s32.totalorder %s476_s12, 1  ;;  %s476_s12 = sphi %s498_s12, %s13_s12  }
   0x2   : > { %p138_p1 = scmp.lt.s32.totalorder %s476_s12, 3 }
   0x4   : > { %p139_p2 = pnand %p404_p0, %p138_p1 }
   0x5   : > { %s405_s18 = sshll.u32 (!%p139_p2), %s400_s13, 2 }
   0x6   : > { %142 = sbr.rel (%p139_p2) target bundleno = 543 (0x21f), region = 32  ;;  %p163_p3 = scmp.lt.s32.totalorder (!%p139_p2), %s405_s18, 7 }
   0xb   : > { %v181_v0 = vld [vmem:[%s565_s1 + $0x18] sm:$0xff]  ;;  %v180_v1 = vld [vmem:[%s565_s1 + $0x10] sm:$0xff]  ;;  %v179_v2 = vld [vmem:[%s565_s1 + $0x8] sm:$0xff]  ;;  %s569_s18 = smov (!%p163_p3, %s405_s18), 7  ;;  %vm189_vm0 = vcmask 261120   ;;  %vm287_vm1 = vcmask 130048  }
   0xc   : > { %424 = vmatprep.subr.mxu0 %v181_v0  ;;  %438 = vmatprep.subr.mxu1 %v181_v0  ;;  %v178_v3 = vld [vmem:[%s565_s1] sm:$0xff]  ;;  %s406_s23 = sshll.u32 %s569_s18, 3 }
   0xd   : > { %425 = vmatpush3.msra.mxu0 %v181_v0  ;;  %442 = vmatpush3.msra.mxu1 %v181_v0  ;;  %s166_s26 = scalar_lea.vmem %s564_s0, %s406_s23  ;;  %v409_v10 = vld [vmem:[%s566_s2] ss:$0 sm:$0xff]  ;;  %s172_s4 = scalar_lea.vmem %s567_s3, %s406_s23 }
   0xe   : > { %426 = vmatprep.subr.mxu0 %v180_v1  ;;  %439 = vmatprep.subr.mxu1 %v180_v1  ;;  %v174_v4 = vld [vmem:[%s166_s26] sm:$0xff]  ;;  %v176_v5 = vld [vmem:[%s166_s26 + $0x10] sm:$0xff]  ;;  %v175_v6 = vld [vmem:[%s166_s26 + $0x8] sm:$0xff] }
   0xf   : > { %427 = vmatpush3.msra.mxu0 %v180_v1  ;;  %443 = vmatpush3.msra.mxu1 %v180_v1  ;;  %v177_v7 = vld [vmem:[%s166_s26 + $0x18] sm:$0xff] }
  0x10   : > { %428 = vmatprep.subr.mxu0 %v179_v2  ;;  %440 = vmatprep.subr.mxu1 %v179_v2 }
  0x11   : > { %429 = vmatpush3.msra.mxu0 %v179_v2  ;;  %444 = vmatpush3.msra.mxu1 %v179_v2 }
  0x12   : > { %430 = vmatprep.subr.mxu0 %v178_v3  ;;  %441 = vmatprep.subr.mxu1 %v178_v3 }
  0x13   : > { %431 = vmatpush3.msra.mxu0 %v178_v3  ;;  %445 = vmatpush3.msra.mxu1 %v178_v3 }
  0x14   : > { %432 = vmatprep.mubr.msk.f32.mxu0 %vm189_vm0, %v174_v4  ;;  %435 = vmatprep.mubr.msk.f32.mxu1 %vm189_vm0, %v176_v5 }
  0x15   : > { %433 = vmatmul.mubr.msk.f32.vlgmr.msra.gmra.mxu0 %vm189_vm0, %v175_v6  ;;  %436 = vmatmul.mubr.msk.f32.vlgmr.msra.gmra.mxu1 %vm189_vm0, %v177_v7 }
  0xd5   : > { %v434_v8 = vpop.f32.mrf.mxu0  ;;  %v437_v9 = vpop.f32.mrf.mxu1 }
  0xd6   : > { %v531_v15 = vadd.f32 %v434_v8, %v409_v10  ;;  %v533_v16 = vadd.f32 %v437_v9, %v409_v10 }
  0xd7   : > { %v268_v11 = vpop.f32.mrf.mxu0  ;;  %v278_v12 = vpop.f32.mrf.mxu1 }
  0xd8   : > { %v269_v13 = vadd.f32 %v409_v10, %v268_v11  ;;  %v529_v14 = vadd.f32 %v409_v10, %v278_v12  ;;  %v297_v19 = vsel %vm287_vm1, %v533_v16, -inf  ;;  %v291_v20 = vsel %vm287_vm1, %v531_v15, -inf }
  0xda   : > { %v294_v17 = vsel %vm287_vm1, %v529_v14, -inf  ;;  %v288_v18 = vsel %vm287_vm1, %v269_v13, -inf }
  0xdb   : > { %295 = vmax.xlane.f32.xlu1 %v294_v17  ;;  %289 = vmax.xlane.f32.xlu0 %v288_v18 }
  0xdf   : > { %298 = vmax.xlane.f32.xlu1 %v297_v19  ;;  %292 = vmax.xlane.f32.xlu0 %v291_v20 }
 0x164   : > { %v296_v21 = vpop.xlane.xlu1 %295  ;;  %v290_v22 = vpop.xlane.xlu0 %289 }
 0x165   : > { %v302_v23 = vsub.f32 %v529_v14, %v296_v21  ;;  %v300_v24 = vsub.f32 %v269_v13, %v290_v22 }
 0x167   : > { %v304_v25 = vmul.f32 1.442695, %v300_v24  ;;  %v308_v26 = vmul.f32 1.442695, %v302_v23 }
 0x168   : > { %v299_v27 = vpop.xlane.xlu1 %298  ;;  %v293_v28 = vpop.xlane.xlu0 %292 }
 0x169   : > { %v303_v29 = vsub.f32 %v533_v16, %v299_v27  ;;  %v301_v30 = vsub.f32 %v531_v15, %v293_v28  ;;  %454 = vpow2.f32 %v304_v25 }
 0x16a   : > { %456 = vpow2.f32 %v308_v26 }
 0x16b   : > { %v306_v31 = vmul.f32 1.442695, %v301_v30  ;;  %v310_v32 = vmul.f32 1.442695, %v303_v29 }
 0x16d   : > { %458 = vpow2.f32 %v306_v31 }
 0x16e   : > { %460 = vpow2.f32 %v310_v32 }
 0x176   : > { %v455_v33 = vpop.eup %454 }
 0x177   : > { %v312_v34 = vsel %vm287_vm1, %v455_v33, 0.0  ;;  %v457_v35 = vpop.eup %456 }
 0x178   : > { %313 = vadd.xlane.f32.xlu0 %v312_v34  ;;  %v318_v37 = vsel %vm287_vm1, %v457_v35, 0.0 }
 0x17a   : > { %v459_v36 = vpop.eup %458 }
 0x17b   : > { %v315_v38 = vsel %vm287_vm1, %v459_v36, 0.0  ;;  %v461_v39 = vpop.eup %460 }
 0x17c   : > { %319 = vadd.xlane.f32.xlu0 %v318_v37  ;;  %316 = vadd.xlane.f32.xlu1 %v315_v38  ;;  %v321_v40 = vsel %vm287_vm1, %v461_v39, 0.0 }
 0x180   : > { %322 = vadd.xlane.f32.xlu1 %v321_v40 }
 0x201   : > { %v314_v41 = vpop.xlane.xlu0 %313 }
 0x202   : > { %462 = vlog2.f32 %v314_v41 }
 0x205   : > { %v317_v42 = vpop.xlane.xlu1 %316  ;;  %v320_v43 = vpop.xlane.xlu0 %319 }
 0x206   : > { %464 = vlog2.f32 %v317_v42 }
 0x207   : > { %466 = vlog2.f32 %v320_v43 }
 0x209   : > { %v323_v44 = vpop.xlane.xlu1 %322 }
 0x20a   : > { %468 = vlog2.f32 %v323_v44 }
 0x20f   : > { %v463_v45 = vpop.eup %462 }
 0x210   : > { %v325_v46 = vmul.f32 0.6931472, %v463_v45 }
 0x212   : > { %v332_v47 = vadd.f32 %v325_v46, %v290_v22 }
 0x213   : > { %v465_v48 = vpop.eup %464 }
 0x214   : > { %v467_v49 = vpop.eup %466  ;;  %v336_v50 = vsub.f32 %v269_v13, %v332_v47  ;;  %v327_v51 = vmul.f32 0.6931472, %v465_v48 }
 0x215   : > { %v329_v52 = vmul.f32 0.6931472, %v467_v49 }
 0x216   : > { %340 = vst.msk [vmem:[%s172_s4] sm:$0xff] %vm287_vm1, %v336_v50  ;;  %v333_v53 = vadd.f32 %v327_v51, %v293_v28 }
 0x217   : > { %v469_v54 = vpop.eup %468  ;;  %v334_v55 = vadd.f32 %v329_v52, %v296_v21 }
 0x218   : > { %v337_v56 = vsub.f32 %v531_v15, %v333_v53  ;;  %v331_v57 = vmul.f32 0.6931472, %v469_v54 }
 0x219   : > { %v338_v58 = vsub.f32 %v529_v14, %v334_v55 }
 0x21a   : > { %341 = vst.msk [vmem:[%s172_s4 + $0x8] sm:$0xff] %vm287_vm1, %v337_v56  ;;  %v335_v59 = vadd.f32 %v331_v57, %v299_v27 }
 0x21b   : > { %342 = vst.msk [vmem:[%s172_s4 + $0x10] sm:$0xff] %vm287_vm1, %v338_v58 }
 0x21c   : > { %v339_v60 = vsub.f32 %v533_v16, %v335_v59 }
 0x21e   : > { %343 = vst.msk [vmem:[%s172_s4 + $0x18] sm:$0xff] %vm287_vm1, %v339_v60 }
 0x21f PF: > { %s13_s12 = sadd.s32 1, %s476_s12  }
 0x220   : > { %p10_p4 = scmp.ge.s32.totalorder %s13_s12, 4  }
 0x222   :  { %12 = sbr.rel (!%p10_p4) target bundleno = 1 (0x1), region = 62 }

</bundles_post_ra>
